<compile_context>
chip_gen: v7x
topology: tpu7x:2x2x1
jax: 0.10.0
libtpu: 0.0.40
codegen_flags: <defaults>
</compile_context>

<pallas_src>
from functools import partial

import jax
import jax.numpy as jnp
from jax.experimental import pallas as pl
from jax.experimental.pallas import tpu as pltpu

NU = 0.3
NU1 = 1.0 / (2.0 * (1.0 + NU))
NU2 = NU / ((1.0 + NU) * (1.0 - 2.0 * NU))


def _round_up(v, m):
    return (v + m - 1) // m * m


def _round_down(v, m):
    return (v // m) * m


def _vmem_capacity_bytes():
    """Physical VMEM per TensorCore (generation-aware; conservative fallback)."""
    try:
        info = pltpu.get_tpu_info()
        cap = int(getattr(info, "vmem_capacity_bytes", 0) or 0)
        if cap > 0:
            return cap
    except Exception:
        pass
    return 64 * 1024 * 1024  # v7x per-TC physical VMEM (smallest current generation)


def _inner_energy_kernel(x_ref, e_ref, cgT_ref, vitg_ref, out_ref, *,
                         g_valid, block_g, matmul_dtype):
    k = pl.program_id(1)  # position along the G reduction axis (innermost)

    # Output block doubles as the accumulator: its index map (b, 0) is constant
    # along k, so it stays resident in VMEM across the whole reduction.
    @pl.when(k == 0)
    def _init():
        out_ref[...] = jnp.zeros_like(out_ref)

    # Em tile = E @ CG2DG.T in the natural MXU orientation (contraction axis M sits
    # on the LHS lane axis / RHS sublane axis) because cgT was transposed once at
    # setup; bf16 operands, f32 accumulation.
    em = jnp.dot(e_ref[...].astype(matmul_dtype), cgT_ref[...],
                 preferred_element_type=jnp.float32)          # (block_b, block_g) f32

    mu = em * NU1
    lmbda = em * NU2

    x = x_ref[...].astype(jnp.float32)                        # (block_b, 4, block_g)
    x0, x1, x2, x3 = x[:, 0, :], x[:, 1, :], x[:, 2, :], x[:, 3, :]
    f0 = 1.0 + x0
    f3 = 1.0 + x3
    J = f0 * f3 - x1 * x2        # must be > 0 (same contract as the PyTorch module)
    Ic = f0 * f0 + f3 * f3 + x1 * x1 + x2 * x2
    logJ = jnp.log(J)
    psi = 0.5 * mu * (Ic - 2.0) - mu * logJ + 0.5 * lmbda * (logJ * logJ)

    # Quadrature-weighted contribution of this G tile. Mask the out-of-bounds tail
    # of the last tile (x is not padded in G, so those lanes may hold garbage and
    # psi could be NaN there; jnp.where kills it before it reaches the sum).
    contrib = psi * vitg_ref[...]
    col = jax.lax.broadcasted_iota(jnp.int32, contrib.shape, 1) + k * block_g
    contrib = jnp.where(col < g_valid, contrib, 0.0)

    out_ref[...] += jnp.sum(contrib, axis=1, keepdims=True)


def _plan_tiles(b_pad, m, g_pad, g_valid, x_itemsize, e_itemsize, mm_itemsize,
                vmem_cap):
    """Pick (block_b, block_g, vmem_limit) so the FULL double-buffered plan
    (cgT + x + vitg streams, resident E, out block) fits the per-generation VMEM."""
    headroom = 16 * 1024 * 1024                       # compiler-internal scratch
    plan_budget = min(vmem_cap - headroom, 48 * 1024 * 1024)

    # Batch-tile candidates: whole batch first (CG2DG streamed exactly once); only
    # fall back to smaller power-of-two divisors (>= 8 sublanes) if VMEM forces it.
    cands, b = [], b_pad
    while b >= 8 and b_pad % b == 0:
        cands.append(b)
        b //= 2
    if not cands:
        cands = [b_pad]

    # Keep block_g <= floor(G/128)*128 so only the final (well-supported) partial
    # edge tile of x overshoots G; block_g must also divide g_pad so the padded
    # constants (cgT, vitg) are never read out of bounds.
    g_cap = g_pad if g_valid < 128 else max(128, _round_down(g_valid, 128))

    block_b, block_g = cands[-1], 128
    for bb in cands:
        fixed = 2 * bb * m * e_itemsize + 2 * bb * 4                 # E + out block
        per_col = 2 * (m * mm_itemsize + 4 * bb * x_itemsize + 4)    # cgT + x + vitg
        avail = plan_budget - fixed
        if avail < 128 * per_col:
            continue                                                  # shrink batch tile
        max_bg = min(g_cap, _round_down(avail // per_col, 128))
        bg = 128
        for d in range(g_pad // 128, 0, -1):
            cand = d * 128
            if g_pad % cand == 0 and cand <= max_bg:
                bg = cand
                break
        block_b, block_g = bb, bg
        break

    fixed = 2 * block_b * m * e_itemsize + 2 * block_b * 4
    per_col = 2 * (m * mm_itemsize + 4 * block_b * x_itemsize + 4)
    plan_bytes = fixed + per_col * block_g
    vmem_limit = int(min(vmem_cap, max(plan_bytes + 8 * 1024 * 1024,
                                       32 * 1024 * 1024)))
    return block_b, block_g, vmem_limit


def make_inner_energy(CG2DG, Vitg, *, matmul_dtype=jnp.bfloat16):
    """Build the Pallas InnerEnergy forward. Mirrors the nn.Module constructor:
    the constant CG2DG / Vitg prep (transpose to (M, Gpad), lane-dense padding,
    bf16 cast) happens exactly once here, never in the per-call hot path."""
    CG2DG = jnp.asarray(CG2DG, jnp.float32)
    Vitg = jnp.asarray(Vitg, jnp.float32)
    G, M = CG2DG.shape
    assert Vitg.shape == (G,)
    g_pad = _round_up(G, 128)                              # lane-dense G

    # Pre-transposed once: (M, Gpad) with G on the lane axis — natural MXU RHS.
    cgT = jnp.pad(CG2DG.T, ((0, 0), (0, g_pad - G))).astype(matmul_dtype)
    vitg = jnp.pad(Vitg, (0, g_pad - G)).reshape(1, g_pad)  # pad -> contributes 0

    vmem_cap = _vmem_capacity_bytes()
    mm_isize = jnp.dtype(matmul_dtype).itemsize

    def forward(x, E):
        B = x.shape[0]
        assert x.shape == (B, 4, G), x.shape
        assert E.shape == (B, M), E.shape

        # Pad the batch to a sublane multiple (zero rows -> Em=0, J=1, psi=0, so the
        # padded rows contribute exactly 0 and are sliced off afterwards).
        b_pad = _round_up(max(B, 8), 8)
        if b_pad != B:
            x = jnp.pad(x, ((0, b_pad - B), (0, 0), (0, 0)))
            E = jnp.pad(E, ((0, b_pad - B), (0, 0)))
        # Tiny-G corner (G < one lane tile): make the single G tile fully in-bounds.
        if G < 128:
            x = jnp.pad(x, ((0, 0), (0, 0), (0, g_pad - G)))

        block_b, block_g, vmem_limit = _plan_tiles(
            b_pad, M, g_pad, G,
            x_itemsize=jnp.dtype(x.dtype).itemsize,
            e_itemsize=jnp.dtype(E.dtype).itemsize,
            mm_itemsize=mm_isize,
            vmem_cap=vmem_cap)
        grid = (b_pad // block_b, g_pad // block_g)

        kernel = partial(_inner_energy_kernel, g_valid=G, block_g=block_g,
                         matmul_dtype=matmul_dtype)

        cost = pl.CostEstimate(
            flops=2 * b_pad * M * g_pad + 14 * b_pad * g_pad,
            transcendentals=b_pad * g_pad,
            bytes_accessed=(M * g_pad * mm_isize) * grid[0]           # cgT stream
                           + x.size * jnp.dtype(x.dtype).itemsize     # x stream
                           + E.size * jnp.dtype(E.dtype).itemsize     # E (once/tile)
                           + b_pad * 4)

        grid_spec = pltpu.PrefetchScalarGridSpec(
            num_scalar_prefetch=0,
            grid=grid,
            in_specs=[
                # x in its native (B, 4, G) layout: no wrapper transpose / HBM pass.
                pl.BlockSpec((block_b, 4, block_g), lambda b, k: (b, 0, k)),
                # E: resident across the whole G reduction for a batch tile.
                pl.BlockSpec((block_b, M), lambda b, k: (b, 0)),
                # CG2DG^T: the dominant HBM stream, double-buffered along k.
                pl.BlockSpec((M, block_g), lambda b, k: (0, k)),
                pl.BlockSpec((1, block_g), lambda b, k: (0, k)),
            ],
            out_specs=pl.BlockSpec((block_b, 1), lambda b, k: (b, 0)),
        )

        out = pl.pallas_call(
            kernel,
            out_shape=jax.ShapeDtypeStruct((b_pad, 1), jnp.float32),
            grid_spec=grid_spec,
            compiler_params=pltpu.CompilerParams(
                # TODO(synk): on v7x, split the G (reduction) axis across the two
                # TensorCores with per-core partial sums (tiny XLA add outside) so
                # the dominant CG2DG stream is shared rather than duplicated.
                dimension_semantics=("parallel", "arbitrary"),
                vmem_limit_bytes=vmem_limit),
            cost_estimate=cost,
        )(x, E, cgT, vitg)
        return out[:B, 0]

    return forward


def inner_energy_reference(x, E, CG2DG, Vitg):
    """Pure-JAX f32 reference matching the PyTorch module exactly."""
    Em = jnp.einsum('ij,kj->ki', CG2DG, E)
    mu, lmbda = Em * NU1, Em * NU2
    J = (1 + x[:, 0, :]) * (1 + x[:, 3, :]) - x[:, 1, :] * x[:, 2, :]
    Ic = (1 + x[:, 0, :]) ** 2 + (1 + x[:, 3, :]) ** 2 + x[:, 1, :] ** 2 + x[:, 2, :] ** 2
    psi = 0.5 * mu * (Ic - 2) - mu * jnp.log(J) + 0.5 * lmbda * jnp.log(J) ** 2
    return jnp.einsum('j,ij->i', Vitg, psi)


if __name__ == "__main__":
    B, N = 2, 16
    M = N * N                       # 256 CG nodes
    G = 2 * (N - 1) * (N - 1)       # 450 quadrature / gradient points

    key = jax.random.PRNGKey(0)
    kx, kE, kcg, kv = jax.random.split(key, 4)

    # Small displacement gradients so J > 0 and log(J) is well defined.
    x = 0.05 * jax.random.normal(kx, (B, 4, G), dtype=jnp.float32)
    E = jax.random.uniform(kE, (B, M), dtype=jnp.float32)
    CG2DG = jax.random.uniform(kcg, (G, M), dtype=jnp.float32) / M   # interpolation-like
    Vitg = jax.random.uniform(kv, (G,), dtype=jnp.float32) / G       # quadrature weights

    inner_energy = make_inner_energy(CG2DG, Vitg)   # constants prepped exactly once
    fwd = jax.jit(inner_energy)
    out = jax.block_until_ready(fwd(x, E))

    ref = jax.block_until_ready(inner_energy_reference(x, E, CG2DG, Vitg))

    assert out.shape == (B,)
    # bf16 is used only for the Em matmul operands (f32 accumulate, f32 psi math),
    # so the error vs the full-f32 reference is a ~0.5% relative bound.
    assert jnp.allclose(out, ref, rtol=2e-2, atol=1e-5), (out, ref)
    print("KERNEL_OK")
</pallas_src>

<mosaic_0001>
module attributes {stable_mosaic.version = 11 : i64} {
  func.func @_inner_energy_kernel(%arg0: i32, %arg1: i32, %arg2: memref<8x4x256xf32, #tpu.memory_space<vmem>>, %arg3: memref<8x256xf32, #tpu.memory_space<vmem>>, %arg4: memref<256x256xbf16, #tpu.memory_space<vmem>>, %arg5: memref<1x256xf32, #tpu.memory_space<vmem>>, %arg6: memref<8x1xf32, #tpu.memory_space<vmem>>) attributes {dimension_semantics = [#tpu.dimension_semantics<parallel>, #tpu.dimension_semantics<arbitrary>], iteration_bounds = array<i64: 1, 2>, scalar_prefetch = 0 : i64, scratch_operands = 0 : i64, tpu.core_type = #tpu.core_type<tc>, window_params = [{transform_indices = @transform_0, window_bounds = array<i64: 8, 4, 256>}, {transform_indices = @transform_1, window_bounds = array<i64: 8, 256>}, {transform_indices = @transform_2, window_bounds = array<i64: 256, 256>}, {transform_indices = @transform_3, window_bounds = array<i64: 1, 256>}, {transform_indices = @transform_4, window_bounds = array<i64: 8, 1>}]} {
    %c0_i32 = arith.constant 0 : i32
    %0 = arith.cmpi eq, %arg1, %c0_i32 : i32
    %1 = arith.extui %0 : i1 to i32
    %c0_i32_0 = arith.constant 0 : i32
    %2 = arith.cmpi ne, %1, %c0_i32_0 : i32
    scf.if %2 {
      %cst_22 = arith.constant 0.000000e+00 : f32
      %63 = vector.broadcast %cst_22 : f32 to vector<8x1xf32>
      %c0_23 = arith.constant 0 : index
      %c0_24 = arith.constant 0 : index
      %64 = vector.load %arg6[%c0_23, %c0_24] : memref<8x1xf32, #tpu.memory_space<vmem>>, vector<8x1xf32>
      tpu.vector_store %arg6[%c0_23, %c0_24], %63 {strides = array<i32>} : memref<8x1xf32, #tpu.memory_space<vmem>>, vector<8x1xf32>,
    } else {
    }
    %c0 = arith.constant 0 : index
    %c0_1 = arith.constant 0 : index
    %3 = vector.load %arg3[%c0, %c0_1] : memref<8x256xf32, #tpu.memory_space<vmem>>, vector<8x256xf32>
    %4 = arith.truncf %3 : vector<8x256xf32> to vector<8x256xbf16>
    %c0_2 = arith.constant 0 : index
    %c0_3 = arith.constant 0 : index
    %5 = vector.load %arg4[%c0_2, %c0_3] : memref<256x256xbf16, #tpu.memory_space<vmem>>, vector<256x256xbf16>
    %cst = arith.constant dense<0.000000e+00> : vector<8x256xf32>
    %6 = tpu.matmul %4, %5, %cst {dimension_numbers = #tpu.dot_dimension_numbers<[1], [0], [0], [1], [0, 0, 1, 1], [], []>} : vector<8x256xbf16>, vector<256x256xbf16>, vector<8x256xf32> -> vector<8x256xf32>
    %cst_4 = arith.constant 0.384615391 : f32
    %7 = vector.broadcast %cst_4 : f32 to vector<8x256xf32>
    %8 = arith.mulf %6, %7 : vector<8x256xf32>
    %cst_5 = arith.constant 0.576923072 : f32
    %9 = vector.broadcast %cst_5 : f32 to vector<8x256xf32>
    %10 = arith.mulf %6, %9 : vector<8x256xf32>
    %c0_6 = arith.constant 0 : index
    %c0_7 = arith.constant 0 : index
    %c0_8 = arith.constant 0 : index
    %11 = vector.load %arg2[%c0_6, %c0_7, %c0_8] : memref<8x4x256xf32, #tpu.memory_space<vmem>>, vector<8x4x256xf32>
    %12 = vector.extract_strided_slice %11 {offsets = [0, 0, 0], sizes = [8, 1, 256], strides = [1, 1, 1]} : vector<8x4x256xf32> to vector<8x1x256xf32>
    %13 = vector.shape_cast %12 : vector<8x1x256xf32> to vector<8x256xf32>
    %14 = vector.extract_strided_slice %11 {offsets = [0, 1, 0], sizes = [8, 1, 256], strides = [1, 1, 1]} : vector<8x4x256xf32> to vector<8x1x256xf32>
    %15 = vector.shape_cast %14 : vector<8x1x256xf32> to vector<8x256xf32>
    %16 = vector.extract_strided_slice %11 {offsets = [0, 2, 0], sizes = [8, 1, 256], strides = [1, 1, 1]} : vector<8x4x256xf32> to vector<8x1x256xf32>
    %17 = vector.shape_cast %16 : vector<8x1x256xf32> to vector<8x256xf32>
    %18 = vector.extract_strided_slice %11 {offsets = [0, 3, 0], sizes = [8, 1, 256], strides = [1, 1, 1]} : vector<8x4x256xf32> to vector<8x1x256xf32>
    %19 = vector.shape_cast %18 : vector<8x1x256xf32> to vector<8x256xf32>
    %cst_9 = arith.constant 1.000000e+00 : f32
    %20 = vector.broadcast %cst_9 : f32 to vector<8x256xf32>
    %21 = arith.addf %20, %13 : vector<8x256xf32>
    %cst_10 = arith.constant 1.000000e+00 : f32
    %22 = vector.broadcast %cst_10 : f32 to vector<8x256xf32>
    %23 = arith.addf %22, %19 : vector<8x256xf32>
    %24 = arith.mulf %21, %23 : vector<8x256xf32>
    %25 = arith.mulf %15, %17 : vector<8x256xf32>
    %26 = arith.subf %24, %25 : vector<8x256xf32>
    %27 = arith.mulf %21, %21 : vector<8x256xf32>
    %28 = arith.mulf %23, %23 : vector<8x256xf32>
    %29 = arith.addf %27, %28 : vector<8x256xf32>
    %30 = arith.mulf %15, %15 : vector<8x256xf32>
    %31 = arith.addf %29, %30 : vector<8x256xf32>
    %32 = arith.mulf %17, %17 : vector<8x256xf32>
    %33 = arith.addf %31, %32 : vector<8x256xf32>
    %34 = math.log %26 : vector<8x256xf32>
    %cst_11 = arith.constant 5.000000e-01 : f32
    %35 = vector.broadcast %cst_11 : f32 to vector<8x256xf32>
    %36 = arith.mulf %35, %8 : vector<8x256xf32>
    %cst_12 = arith.constant 2.000000e+00 : f32
    %37 = vector.broadcast %cst_12 : f32 to vector<8x256xf32>
    %38 = arith.subf %33, %37 : vector<8x256xf32>
    %39 = arith.mulf %36, %38 : vector<8x256xf32>
    %40 = arith.mulf %8, %34 : vector<8x256xf32>
    %41 = arith.subf %39, %40 : vector<8x256xf32>
    %cst_13 = arith.constant 5.000000e-01 : f32
    %42 = vector.broadcast %cst_13 : f32 to vector<8x256xf32>
    %43 = arith.mulf %42, %10 : vector<8x256xf32>
    %44 = arith.mulf %34, %34 : vector<8x256xf32>
    %45 = arith.mulf %43, %44 : vector<8x256xf32>
    %46 = arith.addf %41, %45 : vector<8x256xf32>
    %c0_14 = arith.constant 0 : index
    %c0_15 = arith.constant 0 : index
    %47 = vector.load %arg5[%c0_14, %c0_15] : memref<1x256xf32, #tpu.memory_space<vmem>>, vector<1x256xf32>
    %48 = vector.broadcast %47 : vector<1x256xf32> to vector<8x256xf32>
    %49 = arith.mulf %46, %48 : vector<8x256xf32>
    %50 = tpu.iota {dimensions = array<i32: 1>} : vector<8x256xi32>
    %c256_i32 = arith.constant 256 : i32
    %51 = arith.muli %arg1, %c256_i32 : i32
    %52 = vector.broadcast %51 : i32 to vector<8x256xi32>
    %53 = arith.addi %50, %52 : vector<8x256xi32>
    %c450_i32 = arith.constant 450 : i32
    %54 = vector.broadcast %c450_i32 : i32 to vector<8x256xi32>
    %55 = arith.cmpi slt, %53, %54 : vector<8x256xi32>
    %cst_16 = arith.constant 0.000000e+00 : f32
    %56 = vector.broadcast %cst_16 : f32 to vector<8x256xf32>
    %57 = arith.select %55, %49, %56 : vector<8x256xi1>, vector<8x256xf32>
    %c0_17 = arith.constant 0 : index
    %c0_18 = arith.constant 0 : index
    %58 = vector.load %arg6[%c0_17, %c0_18] : memref<8x1xf32, #tpu.memory_space<vmem>>, vector<8x1xf32>
    %cst_19 = arith.constant dense<0.000000e+00> : vector<8xf32>
    %59 = vector.multi_reduction <add>, %57, %cst_19 [1] : vector<8x256xf32> to vector<8xf32>
    %60 = vector.shape_cast %59 : vector<8xf32> to vector<8x1xf32>
    %61 = arith.addf %58, %60 : vector<8x1xf32>
    %c0_20 = arith.constant 0 : index
    %c0_21 = arith.constant 0 : index
    %62 = vector.load %arg6[%c0_20, %c0_21] : memref<8x1xf32, #tpu.memory_space<vmem>>, vector<8x1xf32>
    tpu.vector_store %arg6[%c0_20, %c0_21], %61 {strides = array<i32>} : memref<8x1xf32, #tpu.memory_space<vmem>>, vector<8x1xf32>,
    return
  }
  func.func @transform_0(%arg0: i32, %arg1: i32) -> (i32, i32, i32) {
    %c0_i32 = arith.constant 0 : i32
    %c0_i32_0 = arith.constant 0 : i32
    return %arg0, %c0_i32, %arg1 : i32, i32, i32
  }
  func.func @transform_1(%arg0: i32, %arg1: i32) -> (i32, i32) {
    %c0_i32 = arith.constant 0 : i32
    %c0_i32_0 = arith.constant 0 : i32
    return %arg0, %c0_i32 : i32, i32
  }
  func.func @transform_2(%arg0: i32, %arg1: i32) -> (i32, i32) {
    %c0_i32 = arith.constant 0 : i32
    %c0_i32_0 = arith.constant 0 : i32
    return %c0_i32, %arg1 : i32, i32
  }
  func.func @transform_3(%arg0: i32, %arg1: i32) -> (i32, i32) {
    %c0_i32 = arith.constant 0 : i32
    %c0_i32_0 = arith.constant 0 : i32
    return %c0_i32, %arg1 : i32, i32
  }
  func.func @transform_4(%arg0: i32, %arg1: i32) -> (i32, i32) {
    %c0_i32 = arith.constant 0 : i32
    %c0_i32_0 = arith.constant 0 : i32
    return %arg0, %c0_i32 : i32, i32
  }
}

</mosaic_0001>

<bundles_post_ra>
// kernel: forward.1
= control target key start
LH: loop header
LB: loop body
LE: loop exit
PB: predicated region body
PF: predicated region fallthrough
CT: control target
= control target key end

     0   :  { %s1747_s15 = smov 0   ;;  %s1749_s16 = smov 0   ;;  %s2198_s0 = inlined_call_operand.vmem [shape: f32[8,4,450], index: 0, kind: input, shape index: {}]   ;;  %s2199_s1 = inlined_call_operand.vmem [shape: f32[8,256], index: 1, kind: input, shape index: {}]   ;;  %s2200_s2 = inlined_call_operand.vmem [shape: bf16[256,512], index: 2, kind: input, shape index: {}]   ;;  %s2201_s3 = inlined_call_operand.vmem [shape: f32[1,512], index: 3, kind: input, shape index: {}]   ;;  %s2202_s4 = inlined_call_operand.vmem [shape: f32[8,1], index: 4, kind: output, shape index: {}]  }
   0x1   :  { %s1751_s17 = smov 0   ;;  %s1753_s18 = smov 0  }
   0x2   :  { %s1755_s19 = smov 0  }
   0x3 LB: > { %s23_s20 = sadd.s32 1, %s1715_s18  ;;  %p42_p1 = scmp.ne.s32.totalorder %s1707_s16, %s1703_s15  ;;  %s1719_s19 = sphi %s1755_s19, %s14_s19   ;;  %s1715_s18 = sphi %s1753_s18, %s2207_s18   ;;  %s1711_s17 = sphi %s1751_s17, %s2206_s17   ;;  %s1707_s16 = sphi %s1749_s16, %s2205_s16   ;;  %s1703_s15 = sphi %s1747_s15, %s2204_s15  }
   0x4   : > { %p24_p0 = scmp.ge.s32.totalorder %s23_s20, 2  ;;  %p43_p2 = scmp.eq.s32.totalorder %s1719_s19, 0 }
   0x5   : > { %s35_s23 = sadd.s32 1, %s1707_s16  ;;  %p1470_p5 = scmp.ge.s32.totalorder %s1719_s19, 2 }
   0x6   : > { %s2209_s20 = smov (%p24_p0, %s23_s20), 0  ;;  %p1778_p3 = por %p43_p2, %p42_p1 }
   0x7   : > { %s31_s22 = ssub.s32 %s1715_s18, %s2209_s20  ;;  %180 = sbr.rel (%p1470_p5) target bundleno = 42 (0x2a), region = 20 }
   0x8   : > { %p33_p4 = scmp.eq.s32.totalorder %s31_s22, 0 }
   0xa   : > { %s1786_s24 = scalar_select %p33_p4, %s1707_s16, %s35_s23  }
   0xe   : > { %183 = sbr.rel (!%p1778_p3) target bundleno = 22 (0x16), region = 24  ;;  %s185_s25 = sand.u32 (%p1778_p3), 1, %s1707_s16  }
   0xf   : > { %s1574_s26 = sshll.u32 (%p1778_p3), %s1715_s18, 3  ;;  %s1471_s27 = sshll.u32 (%p1778_p3), %s185_s25, 6 }
  0x10   : > { %s193_s30 = scalar_lea.vmem (%p1778_p3), %s2198_s0, %s1574_s26  ;;  %s187_s5 = scalar_lea.vmem (%p1778_p3), [#allocation2], %s1471_s27 }
  0x11   : > { %v235_v0 = vld [vmem:[%s193_s30] sm:$0xff] (%p1778_p3)  ;;  %v237_v1 = vld [vmem:[%s193_s30 + $0x10] sm:$0xff] (%p1778_p3) }
  0x12   : > { %v239_v2 = vld [vmem:[%s193_s30 + $0x20] sm:$0xff] (%p1778_p3)  ;;  %236 = vst [vmem:[%s187_s5] sm:$0xff] (%p1778_p3), %v235_v0  ;;  %238 = vst [vmem:[%s187_s5 + $0x8] sm:$0xff] (%p1778_p3), %v237_v1  ;;  %v241_v3 = vld [vmem:[%s193_s30 + $0x30] sm:$0xff] (%p1778_p3) }
  0x13   : > { %240 = vst [vmem:[%s187_s5 + $0x10] sm:$0xff] (%p1778_p3), %v239_v2  ;;  %v243_v4 = vld [vmem:[%s193_s30 + $0x40] sm:$0xff] (%p1778_p3)  ;;  %v245_v5 = vld [vmem:[%s193_s30 + $0x50] sm:$0xff] (%p1778_p3)  ;;  %242 = vst [vmem:[%s187_s5 + $0x18] sm:$0xff] (%p1778_p3), %v241_v3 }
  0x14   : > { %244 = vst [vmem:[%s187_s5 + $0x20] sm:$0xff] (%p1778_p3), %v243_v4  ;;  %246 = vst [vmem:[%s187_s5 + $0x28] sm:$0xff] (%p1778_p3), %v245_v5  ;;  %v247_v6 = vld [vmem:[%s193_s30 + $0x60] sm:$0xff] (%p1778_p3)  ;;  %v249_v7 = vld [vmem:[%s193_s30 + $0x70] sm:$0xff] (%p1778_p3) }
  0x15   : > { %248 = vst [vmem:[%s187_s5 + $0x30] sm:$0xff] %v247_v6  ;;  %250 = vst [vmem:[%s187_s5 + $0x38] sm:$0xff] %v249_v7 }
  0x16 PF: > { %256 = sbr.rel (!%p1778_p3) target bundleno = 42 (0x2a), region = 62  ;;  %s258_s6 = sand.u32 (%p1778_p3), 1, %s1707_s16  }
  0x17   : > { %s1575_s7 = sshll.u32 (%p1778_p3), %s1715_s18, 3  ;;  %s1474_s8 = sshll.u32 (%p1778_p3), %s258_s6, 8 }
  0x18   : > { %s1803_s11 = scalar_lea.vmem (%p1778_p3), %s2200_s2, %s1575_s7  ;;  %s1808_s12 = scalar_lea.vmem (%p1778_p3), [#allocation3], %s1474_s8 }
  0x19   : > { %v353_v8 = vld [vmem:[%s1803_s11] sm:$0xff] (%p1778_p3)  ;;  %v355_v9 = vld [vmem:[%s1803_s11 + $0x10] sm:$0xff] (%p1778_p3) }
  0x1a   : > { %v357_v10 = vld [vmem:[%s1803_s11 + $0x20] sm:$0xff] (%p1778_p3)  ;;  %354 = vst [vmem:[%s1808_s12] sm:$0xff] (%p1778_p3), %v353_v8  ;;  %356 = vst [vmem:[%s1808_s12 + $0x8] sm:$0xff] (%p1778_p3), %v355_v9  ;;  %v359_v11 = vld [vmem:[%s1803_s11 + $0x30] sm:$0xff] (%p1778_p3) }
  0x1b   : > { %358 = vst [vmem:[%s1808_s12 + $0x10] sm:$0xff] (%p1778_p3), %v357_v10  ;;  %v361_v12 = vld [vmem:[%s1803_s11 + $0x40] sm:$0xff] (%p1778_p3)  ;;  %v363_v13 = vld [vmem:[%s1803_s11 + $0x50] sm:$0xff] (%p1778_p3)  ;;  %360 = vst [vmem:[%s1808_s12 + $0x18] sm:$0xff] (%p1778_p3), %v359_v11 }
  0x1c   : > { %362 = vst [vmem:[%s1808_s12 + $0x20] sm:$0xff] (%p1778_p3), %v361_v12  ;;  %364 = vst [vmem:[%s1808_s12 + $0x28] sm:$0xff] (%p1778_p3), %v363_v13  ;;  %v365_v14 = vld [vmem:[%s1803_s11 + $0x60] sm:$0xff] (%p1778_p3)  ;;  %v367_v15 = vld [vmem:[%s1803_s11 + $0x70] sm:$0xff] (%p1778_p3) }
  0x1d   : > { %v369_v16 = vld [vmem:[%s1803_s11 + $0x80] sm:$0xff]  ;;  %366 = vst [vmem:[%s1808_s12 + $0x30] sm:$0xff] %v365_v14  ;;  %368 = vst [vmem:[%s1808_s12 + $0x38] sm:$0xff] %v367_v15  ;;  %v371_v17 = vld [vmem:[%s1803_s11 + $0x90] sm:$0xff] }
  0x1e   : > { %370 = vst [vmem:[%s1808_s12 + $0x40] sm:$0xff] %v369_v16  ;;  %v373_v18 = vld [vmem:[%s1803_s11 + $0xa0] sm:$0xff]  ;;  %v375_v19 = vld [vmem:[%s1803_s11 + $0xb0] sm:$0xff]  ;;  %372 = vst [vmem:[%s1808_s12 + $0x48] sm:$0xff] %v371_v17 }
  0x1f   : > { %374 = vst [vmem:[%s1808_s12 + $0x50] sm:$0xff] %v373_v18  ;;  %376 = vst [vmem:[%s1808_s12 + $0x58] sm:$0xff] %v375_v19  ;;  %v377_v20 = vld [vmem:[%s1803_s11 + $0xc0] sm:$0xff]  ;;  %v379_v21 = vld [vmem:[%s1803_s11 + $0xd0] sm:$0xff] }
  0x20   : > { %v381_v22 = vld [vmem:[%s1803_s11 + $0xe0] sm:$0xff]  ;;  %378 = vst [vmem:[%s1808_s12 + $0x60] sm:$0xff] %v377_v20  ;;  %380 = vst [vmem:[%s1808_s12 + $0x68] sm:$0xff] %v379_v21  ;;  %v383_v23 = vld [vmem:[%s1803_s11 + $0xf0] sm:$0xff] }
  0x21   : > { %382 = vst [vmem:[%s1808_s12 + $0x70] sm:$0xff] %v381_v22  ;;  %v385_v24 = vld [vmem:[%s1803_s11 + $0x100] sm:$0xff]  ;;  %v387_v25 = vld [vmem:[%s1803_s11 + $0x110] sm:$0xff]  ;;  %384 = vst [vmem:[%s1808_s12 + $0x78] sm:$0xff] %v383_v23 }
  0x22   : > { %386 = vst [vmem:[%s1808_s12 + $0x80] sm:$0xff] %v385_v24  ;;  %388 = vst [vmem:[%s1808_s12 + $0x88] sm:$0xff] %v387_v25  ;;  %v389_v26 = vld [vmem:[%s1803_s11 + $0x120] sm:$0xff]  ;;  %v391_v27 = vld [vmem:[%s1803_s11 + $0x130] sm:$0xff] }
  0x23   : > { %v393_v28 = vld [vmem:[%s1803_s11 + $0x140] sm:$0xff]  ;;  %390 = vst [vmem:[%s1808_s12 + $0x90] sm:$0xff] %v389_v26  ;;  %392 = vst [vmem:[%s1808_s12 + $0x98] sm:$0xff] %v391_v27  ;;  %v395_v29 = vld [vmem:[%s1803_s11 + $0x150] sm:$0xff] }
  0x24   : > { %394 = vst [vmem:[%s1808_s12 + $0xa0] sm:$0xff] %v393_v28  ;;  %v397_v30 = vld [vmem:[%s1803_s11 + $0x160] sm:$0xff]  ;;  %v399_v31 = vld [vmem:[%s1803_s11 + $0x170] sm:$0xff]  ;;  %396 = vst [vmem:[%s1808_s12 + $0xa8] sm:$0xff] %v395_v29 }
  0x25   : > { %398 = vst [vmem:[%s1808_s12 + $0xb0] sm:$0xff] %v397_v30  ;;  %400 = vst [vmem:[%s1808_s12 + $0xb8] sm:$0xff] %v399_v31  ;;  %v401_v32 = vld [vmem:[%s1803_s11 + $0x180] sm:$0xff]  ;;  %v403_v33 = vld [vmem:[%s1803_s11 + $0x190] sm:$0xff] }
  0x26   : > { %v405_v34 = vld [vmem:[%s1803_s11 + $0x1a0] sm:$0xff]  ;;  %402 = vst [vmem:[%s1808_s12 + $0xc0] sm:$0xff] %v401_v32  ;;  %404 = vst [vmem:[%s1808_s12 + $0xc8] sm:$0xff] %v403_v33  ;;  %v407_v35 = vld [vmem:[%s1803_s11 + $0x1b0] sm:$0xff] }
  0x27   : > { %406 = vst [vmem:[%s1808_s12 + $0xd0] sm:$0xff] %v405_v34  ;;  %v409_v36 = vld [vmem:[%s1803_s11 + $0x1c0] sm:$0xff]  ;;  %v411_v37 = vld [vmem:[%s1803_s11 + $0x1d0] sm:$0xff]  ;;  %408 = vst [vmem:[%s1808_s12 + $0xd8] sm:$0xff] %v407_v35 }
  0x28   : > { %410 = vst [vmem:[%s1808_s12 + $0xe0] sm:$0xff] %v409_v36  ;;  %412 = vst [vmem:[%s1808_s12 + $0xe8] sm:$0xff] %v411_v37  ;;  %v413_v38 = vld [vmem:[%s1803_s11 + $0x1e0] sm:$0xff]  ;;  %v415_v39 = vld [vmem:[%s1803_s11 + $0x1f0] sm:$0xff] }
  0x29   : > { %414 = vst [vmem:[%s1808_s12 + $0xf0] sm:$0xff] %v413_v38  ;;  %416 = vst [vmem:[%s1808_s12 + $0xf8] sm:$0xff] %v415_v39 }
  0x2a PF: > { %p1477_p6 = scmp.ge.s32.totalorder %s1719_s19, 1  ;;  %p429_p7 = scmp.lt.s32.totalorder %s1719_s19, 3 }
  0x2c   : > { %p430_p8 = pnand %p1477_p6, %p429_p7 }
  0x2d   : > { %s436_s13 = sand.u32 (!%p430_p8), 1, %s1703_s15   ;;  %s1480_s14 = sshll.u32 (!%p430_p8), %s1711_s17, 1 }
  0x2e   : > { %433 = sbr.rel (%p430_p8) target bundleno = 498 (0x1f2), region = 104  ;;  %s1478_s21 = sshll.u32 (!%p430_p8), %s436_s13, 6 }
  0x2f   : > { %s1479_s22 = sshll.u32 (!%p430_p8), %s436_s13, 8  ;;  %p489_p9 = scmp.lt.s32.totalorder (!%p430_p8), %s1480_s14, 3 }
  0x30   : > { %s1881_s27 = scalar_lea.vmem (!%p430_p8), [#allocation2], %s1478_s21  ;;  %s1883_s28 = scalar_lea.vmem (!%p430_p8), [#allocation3], %s1479_s22 }
  0x31   : > { %p1481_p10 = scmp.ne.s32.totalorder (!%p430_p8), %s1711_s17, 0 }
  0x35   : > { %s2211_s14 = smov (!%p489_p9, %s1480_s14), 3  ;;  %500 = sbr.rel (%p1481_p10) target bundleno = 60 (0x3c), region = 116 }
  0x36   : > { %s491_s26 = scalar_lea.vmem %s2201_s3, %s2211_s14  ;;  %vm501_vm0 = vcmask (!%p1481_p10), 7168   ;;  %v1721_v40 = vmov (!%p1481_p10), 0.0  }
  0x37   : > { %502 = vst.msk [vmem:[%s2202_s4] sm:$0xff] (!%p1481_p10), %vm501_vm0, %v1721_v40 }
  0x3c PF: > { %v1617_v41 = vld [vmem:[%s1883_s28 + $0x4] ss:$8 sps:$4 sm:$0xff]   ;;  %v1619_v42 = vld [vmem:[%s1883_s28] ss:$8 sps:$4 sm:$0xff]   ;;  %v1620_v43 = vld [vmem:[%s1883_s28 + $0x14] ss:$8 sps:$4 sm:$0xff]  }
  0x3d   : > { %699 = vmatprep.subr.bf16.mxu0 %v1617_v41  ;;  %v1622_v44 = vld [vmem:[%s1883_s28 + $0x10] ss:$8 sps:$4 sm:$0xff]   ;;  %v1623_v45 = vld [vmem:[%s1883_s28 + $0x24] ss:$8 sps:$4 sm:$0xff]   ;;  %v1625_v46 = vld [vmem:[%s1883_s28 + $0x20] ss:$8 sps:$4 sm:$0xff]  }
  0x3e   : > { %700 = vmatpush1.bf16.msra.mxu0 %v1619_v42  ;;  %v1626_v47 = vld [vmem:[%s1883_s28 + $0x34] ss:$8 sps:$4 sm:$0xff]   ;;  %v1628_v48 = vld [vmem:[%s1883_s28 + $0x30] ss:$8 sps:$4 sm:$0xff]   ;;  %v1629_v49 = vld [vmem:[%s1883_s28 + $0x44] ss:$8 sps:$4 sm:$0xff]  }
  0x3f   : > { %701 = vmatprep.subr.bf16.mxu0 %v1620_v43  ;;  %v1631_v50 = vld [vmem:[%s1883_s28 + $0x40] ss:$8 sps:$4 sm:$0xff]   ;;  %v1632_v51 = vld [vmem:[%s1883_s28 + $0x54] ss:$8 sps:$4 sm:$0xff]   ;;  %v1634_v52 = vld [vmem:[%s1883_s28 + $0x50] ss:$8 sps:$4 sm:$0xff]  }
  0x40   : > { %v1635_v53 = vld [vmem:[%s1883_s28 + $0x64] ss:$8 sps:$4 sm:$0xff]   ;;  %v1637_v56 = vld [vmem:[%s1883_s28 + $0x60] ss:$8 sps:$4 sm:$0xff]   ;;  %v1638_v57 = vld [vmem:[%s1883_s28 + $0x74] ss:$8 sps:$4 sm:$0xff]  }
  0x41   : > { %v504_v54 = vld [vmem:[%s2199_s1 + $0x8] sm:$0xff]  ;;  %v1640_v58 = vld [vmem:[%s1883_s28 + $0x70] ss:$8 sps:$4 sm:$0xff]   ;;  %v1644_v61 = vld [vmem:[%s1883_s28 + $0x94] ss:$8 sps:$4 sm:$0xff]   ;;  %s1570_s8 = sshll.u32 %s1711_s17, 8 }
  0x42   : > { %702 = vmatpush1.bf16.msra.mxu0 %v1622_v44  ;;  %v506_v55 = vpack.c.bf16 %v504_v54, %v504_v54  ;;  %v1641_v59 = vld [vmem:[%s1883_s28 + $0x84] ss:$8 sps:$4 sm:$0xff]   ;;  %v1643_v60 = vld [vmem:[%s1883_s28 + $0x80] ss:$8 sps:$4 sm:$0xff]   ;;  %v1646_v62 = vld [vmem:[%s1883_s28 + $0x90] ss:$8 sps:$4 sm:$0xff]  }
  0x43   : > { %703 = vmatprep.subr.bf16.mxu0 %v1623_v45  ;;  %v1647_v63 = vld [vmem:[%s1883_s28 + $0xa4] ss:$8 sps:$4 sm:$0xff]   ;;  %v1649_v0 = vld [vmem:[%s1883_s28 + $0xa0] ss:$8 sps:$4 sm:$0xff]   ;;  %v1650_v1 = vld [vmem:[%s1883_s28 + $0xb4] ss:$8 sps:$4 sm:$0xff]  }
  0x44   : > { %731 = vmatprep.mubr.bf16.mxu0 %v506_v55  ;;  %v1652_v2 = vld [vmem:[%s1883_s28 + $0xb0] ss:$8 sps:$4 sm:$0xff]   ;;  %v1653_v3 = vld [vmem:[%s1883_s28 + $0xc4] ss:$8 sps:$4 sm:$0xff]   ;;  %v1655_v4 = vld [vmem:[%s1883_s28 + $0xc0] ss:$8 sps:$4 sm:$0xff]  }
  0x45   : > { %v1656_v5 = vld [vmem:[%s1883_s28 + $0xd4] ss:$8 sps:$4 sm:$0xff]   ;;  %v1658_v6 = vld [vmem:[%s1883_s28 + $0xd0] ss:$8 sps:$4 sm:$0xff]   ;;  %v1659_v7 = vld [vmem:[%s1883_s28 + $0xe4] ss:$8 sps:$4 sm:$0xff]  }
  0x46   : > { %704 = vmatpush1.bf16.msra.mxu0 %v1625_v46  ;;  %v1661_v8 = vld [vmem:[%s1883_s28 + $0xe0] ss:$8 sps:$4 sm:$0xff]   ;;  %v1662_v9 = vld [vmem:[%s1883_s28 + $0xf4] ss:$8 sps:$4 sm:$0xff]   ;;  %v1664_v10 = vld [vmem:[%s1883_s28 + $0xf0] ss:$8 sps:$4 sm:$0xff]  }
  0x47   : > { %705 = vmatprep.subr.bf16.mxu0 %v1626_v47  ;;  %v503_v11 = vld [vmem:[%s2199_s1] sm:$0xff]  ;;  %v1931_v14 = vld [vmem:[%s1881_s27 + $0x8] sm:$0xff]  ;;  %v1934_v15 = vld [vmem:[%s1881_s27 + $0x10] sm:$0xff]  ;;  %vm1106_vm1 = vcmask 1041409   ;;  %vm1108_vm2 = vcmask 1042434   ;;  %vm1110_vm3 = vcmask 1043459  }
  0x48   : > { %v505_v12 = vpack.c.bf16 %v503_v11, %v503_v11  ;;  %v1928_v13 = vld [vmem:[%s1881_s27] sm:$0xff]  ;;  %v1937_v16 = vld [vmem:[%s1881_s27 + $0x18] sm:$0xff]  ;;  %v1944_v19 = vld [vmem:[%s1881_s27 + $0x28] sm:$0xff]  ;;  %v753_v21 = vadd.f32 1.0, %v1931_v14  ;;  %v754_v22 = vadd.f32 1.0, %v1934_v15  ;;  %v1523_v33 = vrot.slane %v1931_v14, 9 }
  0x49   : > { %v1940_v17 = vld [vmem:[%s1881_s27 + $0x20] sm:$0xff]  ;;  %v752_v18 = vadd.f32 1.0, %v1928_v13  ;;  %v1947_v20 = vld [vmem:[%s1881_s27 + $0x30] sm:$0xff]  ;;  %v755_v23 = vadd.f32 1.0, %v1937_v16  ;;  %v1954_v25 = vld [vmem:[%s1881_s27 + $0x38] sm:$0xff]  ;;  %v757_v26 = vadd.f32 1.0, %v1944_v19 }
  0x4a   : > { %706 = vmatpush1.bf16.msra.mxu0 %v1628_v48  ;;  %v756_v24 = vadd.f32 1.0, %v1940_v17  ;;  %v758_v27 = vadd.f32 1.0, %v1947_v20  ;;  %v1522_v29 = vrot.slane %v1928_v13, 9  ;;  %v1515_v30 = vrot.slane %v753_v21, 11 }
  0x4b   : > { %707 = vmatprep.subr.bf16.mxu0 %v1629_v49  ;;  %v1514_v28 = vrot.slane %v752_v18, 11  ;;  %v1516_v31 = vrot.slane %v754_v22, 11  ;;  %v1517_v32 = vrot.slane %v755_v23, 11  ;;  %v1961_v34 = vadd.f32 1.0, %v1954_v25 }
  0x4c   : > { %v1518_v35 = vrot.slane %v756_v24, 11  ;;  %v1524_v36 = vrot.slane %v1934_v15, 9  ;;  %v1525_v37 = vrot.slane %v1937_v16, 9  ;;  %v1526_v38 = vrot.slane %v1940_v17, 9 }
  0x4d   : > { %v1527_v39 = vrot.slane %v1944_v19, 9  ;;  %v1519_v40 = vrot.slane %v757_v26, 11  ;;  %v1520_v41 = vrot.slane %v758_v27, 11  ;;  %v792_v42 = vmul.f32 %v1514_v28, %v752_v18 }
  0x4e   : > { %708 = vmatpush1.bf16.msra.mxu0 %v1631_v50  ;;  %v832_v43 = vmul.f32 %v1522_v29, %v1928_v13  ;;  %v793_v44 = vmul.f32 %v1515_v30, %v753_v21  ;;  %v794_v45 = vmul.f32 %v1516_v31, %v754_v22  ;;  %v795_v46 = vmul.f32 %v1517_v32, %v755_v23 }
  0x4f   : > { %709 = vmatprep.subr.bf16.mxu0 %v1632_v51  ;;  %v833_v47 = vmul.f32 %v1523_v33, %v1931_v14  ;;  %v1521_v48 = vrot.slane %v1961_v34, 11  ;;  %v1970_v49 = vmul.f32 %v1518_v35, %v756_v24  ;;  %v1528_v50 = vrot.slane %v1947_v20, 9 }
  0x50   : > { %v1529_v51 = vrot.slane %v1954_v25, 9  ;;  %v1977_v54 = vmul.f32 %v1526_v38, %v1940_v17  ;;  %v1980_v55 = vmul.f32 %v1527_v39, %v1944_v19  ;;  %v931_v29 = vmul.f32 %v1937_v16, %v1937_v16 }
  0x51   : > { %v932_v30 = vmul.f32 %v1940_v17, %v1940_v17  ;;  %v933_v31 = vmul.f32 %v1944_v19, %v1944_v19  ;;  %vm1112_vm4 = vcmask 1044484   ;;  %vm1114_vm5 = vcmask 1045509  }
  0x52   : > { %710 = vmatpush1.bf16.msra.mxu0 %v1634_v52  ;;  %v834_v52 = vmul.f32 %v1524_v36, %v1934_v15  ;;  %vm1116_vm6 = vcmask 1046534   ;;  %vm1118_vm7 = vcmask 1047559   ;;  %vm1355_vm10 = vcmask 7168  }
  0x53   : > { %711 = vmatprep.subr.bf16.mxu0 %v1635_v53  ;;  %v835_v53 = vmul.f32 %v1525_v37, %v1937_v16  ;;  %v1551_v19 = vrot.slane %v933_v31, 9 }
  0x56   : > { %712 = vmatpush1.bf16.msra.mxu0 %v1637_v56  ;;  %v1982_v56 = vmul.f32 %v1519_v40, %v757_v26 }
  0x57   : > { %713 = vmatprep.subr.bf16.mxu0 %v1638_v57  ;;  %v1984_v57 = vmul.f32 %v1520_v41, %v758_v27  ;;  %v1549_v41 = vrot.slane %v931_v29, 9 }
  0x5a   : > { %714 = vmatpush1.bf16.msra.mxu0 %v1640_v58  ;;  %v880_v58 = vmul.f32 %v752_v18, %v752_v18 }
  0x5b   : > { %715 = vmatprep.subr.bf16.mxu0 %v1641_v59  ;;  %v881_v59 = vmul.f32 %v753_v21, %v753_v21 }
  0x5d   : > { %v1539_v11 = vrot.slane %v881_v59, 11 }
  0x5e   : > { %716 = vmatpush1.bf16.msra.mxu0 %v1643_v60  ;;  %v1530_v60 = vrot.slane %v832_v43, 9 }
  0x5f   : > { %717 = vmatprep.subr.bf16.mxu0 %v1644_v61  ;;  %v1531_v61 = vrot.slane %v833_v47, 9  ;;  %v921_v36 = vadd.f32 %v1539_v11, %v881_v59 }
  0x61   : > { %v873_v18 = vsub.f32 %v793_v44, %v1531_v61 }
  0x62   : > { %718 = vmatpush1.bf16.msra.mxu0 %v1646_v62  ;;  %v882_v62 = vmul.f32 %v754_v22, %v754_v22 }
  0x63   : > { %719 = vmatprep.subr.bf16.mxu0 %v1647_v63  ;;  %v883_v63 = vmul.f32 %v755_v23, %v755_v23 }
  0x64   : > { %v1540_v21 = vrot.slane %v882_v62, 11 }
  0x65   : > { %v1541_v22 = vrot.slane %v883_v63, 11 }
  0x66   : > { %720 = vmatpush1.bf16.msra.mxu0 %v1649_v0  ;;  %v1987_v0 = vmul.f32 %v1528_v50, %v1947_v20 }
  0x67   : > { %721 = vmatprep.subr.bf16.mxu0 %v1650_v1  ;;  %v1990_v1 = vmul.f32 %v1529_v51, %v1954_v25  ;;  %v923_v37 = vadd.f32 %v1541_v22, %v883_v63  ;;  %v1557_v63 = vrot.slane %v931_v29, 10 }
  0x68   : > { %v1536_v11 = vrot.slane %v1987_v0, 9 }
  0x69   : > { %v971_v59 = vadd.f32 %v1549_v41, %v923_v37 }
  0x6a   : > { %722 = vmatpush1.bf16.msra.mxu0 %v1652_v2  ;;  %v884_v2 = vmul.f32 %v756_v24, %v756_v24  ;;  %v928_v24 = vmul.f32 %v1928_v13, %v1928_v13  ;;  %v922_v13 = vadd.f32 %v1540_v21, %v882_v62  ;;  %v1537_v21 = vrot.slane %v1990_v1, 9 }
  0x6b   : > { %723 = vmatprep.subr.bf16.mxu0 %v1653_v3  ;;  %v885_v3 = vmul.f32 %v757_v26, %v757_v26  ;;  %v929_v26 = vmul.f32 %v1931_v14, %v1931_v14  ;;  %v934_v14 = vmul.f32 %v1947_v20, %v1947_v20  ;;  %v878_v1 = vsub.f32 %v1984_v57, %v1536_v11 }
  0x6c   : > { %v1542_v23 = vrot.slane %v884_v2, 11  ;;  %v1546_v39 = vrot.slane %v928_v24, 9 }
  0x6d   : > { %v1543_v28 = vrot.slane %v885_v3, 11  ;;  %v1547_v40 = vrot.slane %v929_v26, 9  ;;  %v1552_v51 = vrot.slane %v934_v14, 9 }
  0x6e   : > { %724 = vmatpush1.bf16.msra.mxu0 %v1655_v4  ;;  %v1532_v4 = vrot.slane %v834_v52, 9  ;;  %v924_v38 = vadd.f32 %v1542_v23, %v884_v2  ;;  %v1042_v2 = vlaneseq  ;;  %v1003_v23 = vadd.f32 %v1557_v63, %v971_v59 }
  0x6f   : > { %725 = vmatprep.subr.bf16.mxu0 %v1656_v5  ;;  %v1533_v5 = vrot.slane %v835_v53, 9  ;;  %v925_v16 = vadd.f32 %v1543_v28, %v885_v3  ;;  %v969_v53 = vadd.f32 %v1547_v40, %v921_v36  ;;  %v1559_v3 = vrot.slane %v933_v31, 10 }
  0x70   : > { %v874_v43 = vsub.f32 %v794_v45, %v1532_v4  ;;  %v1560_v4 = vrot.slane %v934_v14, 10  ;;  %v2018_v28 = vshrl.u32 %v1042_v2, 7 }
  0x71   : > { %v875_v44 = vsub.f32 %v795_v46, %v1533_v5  ;;  %v973_v61 = vadd.f32 %v1551_v19, %v925_v16  ;;  %v1558_v46 = vrot.slane %v932_v30, 10  ;;  %v799_v5 = vmul.f32 %v1521_v48, %v1961_v34 }
  0x72   : > { %726 = vmatpush1.bf16.msra.mxu0 %v1658_v6  ;;  %v1534_v6 = vrot.slane %v1977_v54, 9  ;;  %v1554_v54 = vrot.slane %v928_v24, 10  ;;  %v2057_v41 = vsub.s32 4, %v2018_v28 }
  0x73   : > { %727 = vmatprep.subr.bf16.mxu0 %v1659_v7  ;;  %v1535_v7 = vrot.slane %v1980_v55, 9  ;;  %v1005_v48 = vadd.f32 %v1559_v3, %v973_v61  ;;  %v2030_v55 = vadd.f32 -2.0, %v1003_v23 }
  0x75   : > { %v877_v24 = vsub.f32 %v1982_v56, %v1535_v7  ;;  %v2033_v56 = vsub.s32 0, %v2018_v28 }
  0x76   : > { %728 = vmatpush1.bf16.msra.mxu0 %v1661_v8  ;;  %v886_v8 = vmul.f32 %v758_v27, %v758_v27  ;;  %v930_v27 = vmul.f32 %v1934_v15, %v1934_v15  ;;  %v935_v15 = vmul.f32 %v1954_v25, %v1954_v25  ;;  %v1555_v25 = vrot.slane %v929_v26, 10 }
  0x77   : > { %729 = vmatprep.subr.bf16.mxu0 %v1662_v9  ;;  %v887_v9 = vmul.f32 %v1961_v34, %v1961_v34 }
  0x78   : > { %v1544_v32 = vrot.slane %v886_v8, 11  ;;  %v1548_v17 = vrot.slane %v930_v27, 9  ;;  %v1553_v52 = vrot.slane %v935_v15, 9  ;;  %v1556_v62 = vrot.slane %v930_v27, 10 }
  0x79   : > { %v1545_v33 = vrot.slane %v887_v9, 11 }
  0x7a   : > { %730 = vmatpush1.bf16.msra.mxu0 %v1664_v10  ;;  %v1538_v10 = vrot.slane %v880_v58, 11  ;;  %v926_v47 = vadd.f32 %v1544_v32, %v886_v8  ;;  %v876_v8 = vsub.f32 %v1970_v49, %v1534_v6  ;;  %v2037_v32 = vadd.f32 -2.0, %v1005_v48 }
  0x7b   : > { %v927_v50 = vadd.f32 %v1545_v33, %v887_v9 }
  0x7c   : > { %v920_v35 = vadd.f32 %v1538_v10, %v880_v58  ;;  %v970_v58 = vadd.f32 %v1548_v17, %v922_v13  ;;  %v974_v45 = vadd.f32 %v1552_v51, %v926_v47  ;;  %v1001_v10 = vadd.f32 %v1555_v25, %v969_v53 }
  0x7d   : > { %732 = vmatmul.mubr.bf16.vlgmr.msra.gmra.mrb[0].mxu0 %v505_v12  ;;  %v872_v12 = vsub.f32 %v792_v42, %v1530_v60  ;;  %v1550_v42 = vrot.slane %v932_v30, 9  ;;  %v879_v30 = vsub.f32 %v799_v5, %v1537_v21  ;;  %v1069_v17 = vrot.slane %v2030_v55, %v2033_v56 }
  0x7e   : > { %v968_v20 = vadd.f32 %v1546_v39, %v920_v35  ;;  %v1002_v22 = vadd.f32 %v1556_v62, %v970_v58  ;;  %v1006_v49 = vadd.f32 %v1560_v4, %v974_v45  ;;  %v2025_v26 = vadd.f32 -2.0, %v1001_v10 }
  0x7f   : > { %1665 = vlog2.f32 %v872_v12  ;;  %v972_v60 = vadd.f32 %v1550_v42, %v924_v38  ;;  %v975_v12 = vadd.f32 %v1553_v52, %v927_v50  ;;  %v2050_v38 = vstv %s1570_s8 }
  0x80   : > { %1667 = vlog2.f32 %v873_v18  ;;  %v1000_v9 = vadd.f32 %v1554_v54, %v968_v20  ;;  %v1561_v18 = vrot.slane %v935_v15, 10  ;;  %v2028_v31 = vadd.f32 -2.0, %v1002_v22 }
  0x81   : > { %1669 = vlog2.f32 %v874_v43  ;;  %v1004_v34 = vadd.f32 %v1558_v46, %v972_v60  ;;  %v2039_v33 = vadd.f32 -2.0, %v1006_v49  ;;  %v1053_v37 = vrot.slane %v2025_v26, %v2033_v56 }
  0x82   : > { %1671 = vlog2.f32 %v875_v44  ;;  %v2023_v0 = vadd.f32 -2.0, %v1000_v9  ;;  %v1007_v29 = vadd.f32 %v1561_v18, %v975_v12  ;;  %v2048_v15 = vand.u32 127, %v1042_v2 }
  0x83   : > { %1673 = vlog2.f32 %v876_v8  ;;  %v2035_v7 = vadd.f32 -2.0, %v1004_v34  ;;  %v1061_v40 = vrot.slane %v2028_v31, %v2033_v56  ;;  %v1085_v47 = vrot.slane %v2037_v32, %v2033_v56 }
  0x84   : > { %1675 = vlog2.f32 %v877_v24  ;;  %v1045_v13 = vrot.slane %v2023_v0, %v2033_v56  ;;  %v2046_v14 = vadd.f32 -2.0, %v1007_v29  ;;  %v1093_v50 = vrot.slane %v2039_v33, %v2033_v56 }
  0x85   : > { %1677 = vlog2.f32 %v878_v1  ;;  %v1077_v42 = vrot.slane %v2035_v7, %v2033_v56  ;;  %v1049_v25 = vrot.slane %v2023_v0, %v2057_v41  ;;  %v1057_v58 = vrot.slane %v2025_v26, %v2057_v41 }
  0x86   : > { %1679 = vlog2.f32 %v879_v30  ;;  %v1107_v19 = vsel %vm1106_vm1, %v1053_v37, %v1045_v13  ;;  %v1101_v54 = vrot.slane %v2046_v14, %v2033_v56  ;;  %v1065_v46 = vrot.slane %v2028_v31, %v2057_v41 }
  0x87   : > { %v1109_v59 = vsel %vm1108_vm2, %v1061_v40, %v1107_v19  ;;  %v1073_v12 = vrot.slane %v2030_v55, %v2057_v41  ;;  %v1120_v24 = vsel %vm1106_vm1, %v1057_v58, %v1049_v25  ;;  %v1081_v40 = vrot.slane %v2035_v7, %v2057_v41 }
  0x88   : > { %v1111_v10 = vsel %vm1110_vm3, %v1069_v17, %v1109_v59  ;;  %v1089_v58 = vrot.slane %v2037_v32, %v2057_v41  ;;  %v1097_v32 = vrot.slane %v2039_v33, %v2057_v41  ;;  %v1105_v33 = vrot.slane %v2046_v14, %v2057_v41 }
  0x89   : > { %v1666_v6 = vpop.eup %1665 }
  0x8a   : > { %v1668_v27 = vpop.eup %1667  ;;  %v1009_v36 = vmul.f32 0.6931472, %v1666_v6 }
  0x8b   : > { %v1670_v35 = vpop.eup %1669  ;;  %v1011_v57 = vmul.f32 0.6931472, %v1668_v27  ;;  %v1113_v27 = vsel %vm1112_vm4, %v1077_v42, %v1111_v10 }
  0x8c   : > { %v1672_v16 = vpop.eup %1671  ;;  %v1013_v39 = vmul.f32 0.6931472, %v1670_v35  ;;  %v1225_v43 = vmul.f32 %v1009_v36, %v1009_v36  ;;  %v1142_v51 = vrot.slane %v1009_v36, %v2033_v56  ;;  %v1146_v61 = vrot.slane %v1009_v36, %v2057_v41 }
  0x8d   : > { %v1226_v44 = vmul.f32 %v1011_v57, %v1011_v57  ;;  %v1150_v52 = vrot.slane %v1011_v57, %v2033_v56  ;;  %v1674_v20 = vpop.eup %1673  ;;  %v1015_v53 = vmul.f32 0.6931472, %v1672_v16  ;;  %v1154_v62 = vrot.slane %v1011_v57, %v2057_v41 }
  0x8e   : > { %v1227_v60 = vmul.f32 %v1013_v39, %v1013_v39  ;;  %v1158_v63 = vrot.slane %v1013_v39, %v2033_v56  ;;  %v1244_v2 = vrot.slane %v1225_v43, %v2033_v56  ;;  %v1676_v3 = vpop.eup %1675  ;;  %v1017_v4 = vmul.f32 0.6931472, %v1674_v20 }
  0x8f   : > { %v1252_v45 = vrot.slane %v1226_v44, %v2033_v56  ;;  %v1203_v5 = vsel %vm1106_vm1, %v1150_v52, %v1142_v51  ;;  %v1248_v8 = vrot.slane %v1225_v43, %v2057_v41  ;;  %v1256_v9 = vrot.slane %v1226_v44, %v2057_v41  ;;  %v1678_v21 = vpop.eup %1677 }
  0x90   : > { %v1228_v11 = vmul.f32 %v1015_v53, %v1015_v53  ;;  %v1162_v18 = vrot.slane %v1013_v39, %v2057_v41  ;;  %v1166_v22 = vrot.slane %v1015_v53, %v2033_v56  ;;  %v1260_v23 = vrot.slane %v1227_v60, %v2033_v56  ;;  %v1680_v48 = vpop.eup %1679 }
  0x91   : > { %v1210_v34 = vsel %vm1106_vm1, %v1154_v62, %v1146_v61  ;;  %v1019_v49 = vmul.f32 0.6931472, %v1676_v3  ;;  %v1204_v6 = vsel %vm1108_vm2, %v1158_v63, %v1203_v5  ;;  %v1305_v0 = vsel %vm1106_vm1, %v1252_v45, %v1244_v2 }
  0x92   : > { %v1264_v26 = vrot.slane %v1227_v60, %v2057_v41  ;;  %v1229_v1 = vmul.f32 %v1017_v4, %v1017_v4  ;;  %v1170_v29 = vrot.slane %v1015_v53, %v2057_v41  ;;  %v1312_v30 = vsel %vm1106_vm1, %v1256_v9, %v1248_v8 }
  0x93   : > { %v1174_v31 = vrot.slane %v1017_v4, %v2033_v56  ;;  %v1268_v55 = vrot.slane %v1228_v11, %v2033_v56  ;;  %v1121_v35 = vsel %vm1108_vm2, %v1065_v46, %v1120_v24  ;;  %v1211_v36 = vsel %vm1108_vm2, %v1162_v18, %v1210_v34 }
  0x94   : > { %v1021_v57 = vmul.f32 0.6931472, %v1678_v21  ;;  %v1205_v13 = vsel %vm1110_vm3, %v1166_v22, %v1204_v6  ;;  %v1306_v37 = vsel %vm1108_vm2, %v1260_v23, %v1305_v0  ;;  %v1272_v16 = vrot.slane %v1228_v11, %v2057_v41 }
  0x95   : > { %v1230_v39 = vmul.f32 %v1019_v49, %v1019_v49  ;;  %v1178_v17 = vrot.slane %v1017_v4, %v2057_v41  ;;  %v1313_v42 = vsel %vm1108_vm2, %v1264_v26, %v1312_v30  ;;  %v1182_v19 = vrot.slane %v1019_v49, %v2033_v56 }
  0x96   : > { %v1276_v43 = vrot.slane %v1229_v1, %v2033_v56  ;;  %v1122_v44 = vsel %vm1110_vm3, %v1073_v12, %v1121_v35  ;;  %v1212_v51 = vsel %vm1110_vm3, %v1170_v29, %v1211_v36  ;;  %v1023_v52 = vmul.f32 0.6931472, %v1680_v48 }
  0x97   : > { %v1206_v20 = vsel %vm1112_vm4, %v1174_v31, %v1205_v13  ;;  %v1307_v53 = vsel %vm1110_vm3, %v1268_v55, %v1306_v37  ;;  %v1280_v7 = vrot.slane %v1229_v1, %v2057_v41  ;;  %v1231_v25 = vmul.f32 %v1021_v57, %v1021_v57 }
  0x98   : > { %v1186_v59 = vrot.slane %v1019_v49, %v2057_v41  ;;  %v1314_v60 = vsel %vm1110_vm3, %v1272_v16, %v1313_v42  ;;  %v1115_v61 = vsel %vm1114_vm5, %v1085_v47, %v1113_v27  ;;  %v1284_v62 = vrot.slane %v1230_v39, %v2033_v56 }
  0x99   : > { %v1123_v63 = vsel %vm1112_vm4, %v1081_v40, %v1122_v44  ;;  %v1213_v2 = vsel %vm1112_vm4, %v1178_v17, %v1212_v51  ;;  %v1190_v45 = vrot.slane %v1021_v57, %v2033_v56  ;;  %v1207_v46 = vsel %vm1114_vm5, %v1182_v19, %v1206_v20 }
  0x9a   : > { %v1308_v3 = vsel %vm1112_vm4, %v1276_v43, %v1307_v53  ;;  %v1288_v4 = vrot.slane %v1230_v39, %v2057_v41  ;;  %v1232_v5 = vmul.f32 %v1023_v52, %v1023_v52  ;;  %v1194_v47 = vrot.slane %v1021_v57, %v2057_v41 }
  0x9b   : > { %v1315_v8 = vsel %vm1112_vm4, %v1280_v7, %v1314_v60  ;;  %v1117_v9 = vsel %vm1116_vm6, %v1093_v50, %v1115_v61  ;;  %v1292_v10 = vrot.slane %v1231_v25, %v2033_v56  ;;  %v1124_v11 = vsel %vm1114_vm5, %v1089_v58, %v1123_v63 }
  0x9c   : > { %v1214_v12 = vsel %vm1114_vm5, %v1186_v59, %v1213_v2  ;;  %v1198_v18 = vrot.slane %v1023_v52, %v2033_v56  ;;  %v1309_v21 = vsel %vm1114_vm5, %v1284_v62, %v1308_v3  ;;  %v1296_v22 = vrot.slane %v1231_v25, %v2057_v41 }
  0x9d   : > { %v1341_v23 = vadd.s32 128, %v2048_v15  ;;  %v1208_v24 = vsel %vm1116_vm6, %v1190_v45, %v1207_v46  ;;  %v1202_v50 = vrot.slane %v1023_v52, %v2057_v41  ;;  %v1316_v34 = vsel %vm1114_vm5, %v1288_v4, %v1315_v8 }
  0x9e   : > { %v1119_v49 = vsel %vm1118_vm7, %v1101_v54, %v1117_v9  ;;  %v1300_v6 = vrot.slane %v1232_v5, %v2033_v56  ;;  %v1125_v0 = vsel %vm1116_vm6, %v1097_v32, %v1124_v11  ;;  %v1215_v26 = vsel %vm1116_vm6, %v1194_v47, %v1214_v12 }
  0x9f   : > { %v1310_v29 = vsel %vm1116_vm6, %v1292_v10, %v1309_v21  ;;  %v1304_v31 = vrot.slane %v1232_v5, %v2057_v41  ;;  %v1209_v55 = vsel %vm1118_vm7, %v1198_v18, %v1208_v24  ;;  %v1317_v54 = vsel %vm1116_vm6, %v1296_v22, %v1316_v34  ;;  %v1325_v41 = vld [vmem:[%s491_s26] sm:$0x3] }
  0xa0   : > { %v1126_v37 = vsel %vm1118_vm7, %v1105_v33, %v1125_v0  ;;  %v1216_v16 = vsel %vm1118_vm7, %v1202_v50, %v1215_v26  ;;  %v1311_v40 = vsel %vm1118_vm7, %v1300_v6, %v1310_v29  ;;  %v1333_v19 = vsub.s32 1, %v2018_v28 }
  0xa1   : > { %v1318_v51 = vsel %vm1118_vm7, %v1304_v31, %v1317_v54  ;;  %v1344_v53 = vadd.s32 %v2050_v38, %v2048_v15  ;;  %v1330_v58 = vrot.slane %v1325_v41, %v2033_v56  ;;  %v1345_v59 = vadd.s32 %v2050_v38, %v1341_v23  ;;  %v1350_v15 = vld [vmem:[%s2202_s4] sm:$0xff] }
  0xa2   : > { %v1334_v62 = vrot.slane %v1325_v41, %v1333_v19 }
  0xa3   : > { %vm1346_vm8 = vcmp.lt.s32.totalorder %v1344_v53, 450  ;;  %vm1347_vm9 = vcmp.lt.s32.totalorder %v1345_v59, 450 }
 0x150   : > { %v733_v48 = vpop.f32.mrb[0].mxu0 }
 0x151   : > { %v740_v27 = vmul.f32 0.3846154, %v733_v48  ;;  %v742_v1 = vmul.f32 0.5769231, %v733_v48  ;;  %v735_v30 = vpop.f32.mrb[1].mxu0 }
 0x152   : > { %v741_v35 = vmul.f32 0.3846154, %v735_v30  ;;  %v743_v14 = vmul.f32 0.5769231, %v735_v30  ;;  %v737_v36 = vpop.f32.mrb[2].mxu0 }
 0x153   : > { %v1024_v57 = vmul.f32 0.5, %v740_v27  ;;  %v1223_v13 = vmul.f32 0.5, %v742_v1  ;;  %v738_v39 = vpop.f32.mrb[3].mxu0  ;;  %v1219_v44 = vmul.f32 %v1209_v55, %v740_v27 }
 0x154   : > { %v1025_v17 = vmul.f32 0.5, %v741_v35  ;;  %v1224_v42 = vmul.f32 0.5, %v743_v14  ;;  %v1220_v20 = vmul.f32 %v1216_v16, %v741_v35 }
 0x155   : > { %v1129_v43 = vmul.f32 %v1119_v49, %v1024_v57  ;;  %v1321_v25 = vmul.f32 %v1311_v40, %v1223_v13 }
 0x156   : > { %v1130_v52 = vmul.f32 %v1126_v37, %v1025_v17  ;;  %v1322_v61 = vmul.f32 %v1318_v51, %v1224_v42 }
 0x157   : > { %v1221_v7 = vsub.f32 %v1129_v43, %v1219_v44 }
 0x158   : > { %v1222_v60 = vsub.f32 %v1130_v52, %v1220_v20 }
 0x159   : > { %v1323_v63 = vadd.f32 %v1321_v25, %v1221_v7 }
 0x15a   : > { %v1324_v28 = vadd.f32 %v1322_v61, %v1222_v60 }
 0x15b   : > { %v1337_v2 = vmul.f32 %v1330_v58, %v1323_v63 }
 0x15c   : > { %v1338_v45 = vmul.f32 %v1334_v62, %v1324_v28 }
 0x15d   : > { %v1348_v46 = vsel %vm1346_vm8, %v1337_v2, 0.0 }
 0x15e   : > { %v1349_v3 = vsel %vm1347_vm9, %v1338_v45, 0.0 }
 0x15f   : > { %v1351_v4 = vadd.f32 %v1349_v3, %v1348_v46 }
 0x161   : > { %1352 = vadd.xlane.f32.xlu0 %v1351_v4 }
 0x1ee   : > { %v1353_v56 = vpop.xlane.xlu0 %1352 }
 0x1ef   : > { %v1354_v38 = vadd.f32 %v1353_v56, %v1350_v15 }
 0x1f1   : > { %1356 = vst.msk [vmem:[%s2202_s4] sm:$0xff] %vm1355_vm10, %v1354_v38 }
 0x1f2 PF: > { %s14_s19 = sadd.s32 1, %s1719_s19   ;;  %s2204_s15 = smov %s1707_s16 }
 0x1f3   : > { %p11_p11 = scmp.ge.s32.totalorder %s14_s19, 4   ;;  %s2205_s16 = smov %s1786_s24 }
 0x1f4   : > { %s2206_s17 = smov %s1715_s18  ;;  %s2207_s18 = smov %s2209_s20 }
 0x1f5   :  { %13 = sbr.rel (!%p11_p11) target bundleno = 3 (0x3), region = 165 }

</bundles_post_ra>
